<compile_context>
chip_gen: v7x
topology: tpu7x:2x2x1
jax: 0.10.0
libtpu: 0.0.40
codegen_flags: <defaults>
</compile_context>

<pallas_src>
import functools

import jax
import jax.numpy as jnp
from jax import lax
from jax.experimental import pallas as pl
from jax.experimental.pallas import tpu as pltpu


def _rkd_kernel(s_ref, t_ref, out_ref, *scratch, n, ca, num_chunks,
                alpha_1, alpha_2):
    eps = jnp.float32(1e-12)
    nn = n * n

    def gram(x):
        # e @ e.T on the MXU, native operand dtype, f32 accumulation.
        return lax.dot_general(x, x, (((1,), (1,)), ((), ())),
                               preferred_element_type=jnp.float32)

    g_s = gram(s_ref[...])
    g_t = gram(t_ref[...])

    ii = lax.broadcasted_iota(jnp.int32, (n, n), 0)
    jj = lax.broadcasted_iota(jnp.int32, (n, n), 1)
    diag = ii == jj

    def dist_mats(g):
        # Squared norms straight off the gram diagonal (no pass over e).
        gd = jnp.where(diag, g, 0.0)
        sq_col = jnp.sum(gd, axis=1, keepdims=True)            # (n, 1)
        sq_row = jnp.sum(gd, axis=0, keepdims=True)            # (1, n)
        res = jnp.maximum(sq_col + sq_row - 2.0 * g, eps)      # clamped d^2
        d2 = jnp.where(diag, 0.0, res)
        d = jnp.where(diag, 0.0, jnp.sqrt(res))
        inv = jnp.where(diag, 0.0, lax.rsqrt(res))             # 1/dist, 0 on diag
        return d2, d, inv

    d2_s, d_s, inv_s = dist_mats(g_s)
    d2_t, d_t, inv_t = dist_mats(g_t)

    def huber_sum(a, b):
        # smooth_l1(beta=1, reduction='sum'), branchless form.
        ad = jnp.abs(a - b)
        m = jnp.minimum(ad, 1.0)
        return jnp.sum(m * (ad - 0.5 * m))

    # ---------------- RkdDistance ----------------
    # Every off-diagonal distance is >= sqrt(eps) > 0, so the positive-pair
    # count is exactly n*(n-1): no mask build / masked reduction needed.
    inv_cnt = jnp.float32(1.0 / (n * (n - 1)))
    s_nd = d_s * (jnp.float32(1.0) / (jnp.sum(d_s) * inv_cnt))
    t_nd = d_t * (jnp.float32(1.0) / (jnp.sum(d_t) * inv_cnt))
    dist_loss = huber_sum(s_nd, t_nd) * jnp.float32(1.0 / n)

    # ---------------- RkdAngle ----------------
    # angle_i[a, b] = (h[i,a] + h[i,b] - h[a,b]) * inv[i,a] * inv[i,b],
    # with h = 0.5 * d2, laid out as (chunk, n*n) tiles, lane index c = a*n + b.
    h_s = 0.5 * d2_s
    h_t = 0.5 * d2_t

    # Constant 0/1 selection matrices (iota compares only; no div/mod/reshape):
    #   R[a', a*n + b] = (a' == a)  ->  X @ R lane-"repeats" each row entry n x
    #   T[b', a*n + b] = (b' == b)  ->  X @ T lane-"tiles"   each row n x
    row = lax.broadcasted_iota(jnp.int32, (n, nn), 0)
    col = lax.broadcasted_iota(jnp.int32, (n, nn), 1)
    lo = row * n
    r_mask = (col >= lo) & (col < lo + n)
    R = r_mask.astype(jnp.float32)
    rowf = row.astype(jnp.float32)
    quot = jnp.sum(jnp.where(r_mask, rowf, 0.0), axis=0, keepdims=True)  # c // n
    colf = lax.broadcasted_iota(jnp.int32, (1, nn), 1).astype(jnp.float32)
    T = (rowf == (colf - quot * jnp.float32(n))).astype(jnp.float32)     # b'==c%n

    def flat_row(h):
        # (1, nn) row holding h[c // n, c % n] in lane c  (i.e. h[a, b]).
        return jnp.sum(R * jnp.dot(h, T, preferred_element_type=jnp.float32),
                       axis=0, keepdims=True)

    c_s = flat_row(h_s)
    c_t = flat_row(h_t)

    def packed_grams(h_rows, inv_rows, c_row):
        # (chunk, n) anchor rows -> (chunk, n*n) packed per-anchor angle grams.
        a = jnp.dot(h_rows, R, preferred_element_type=jnp.float32)      # h[i, a]
        b = jnp.dot(h_rows, T, preferred_element_type=jnp.float32)      # h[i, b]
        u = jnp.dot(inv_rows, R, preferred_element_type=jnp.float32)    # inv[i, a]
        v = jnp.dot(inv_rows, T, preferred_element_type=jnp.float32)    # inv[i, b]
        return (a + b - c_row) * (u * v)

    if num_chunks == 1:
        # All anchors in one (n, n*n) tile: no scratch, no loop.
        angle_sum = huber_sum(packed_grams(h_s, inv_s, c_s),
                              packed_grams(h_t, inv_t, c_t))
    else:
        hs_ref, ht_ref, us_ref, ut_ref = scratch
        hs_ref[pl.ds(0, n), :] = h_s
        ht_ref[pl.ds(0, n), :] = h_t
        us_ref[pl.ds(0, n), :] = inv_s
        ut_ref[pl.ds(0, n), :] = inv_t
        pad = num_chunks * ca - n
        if pad:
            z = jnp.zeros((pad, n), jnp.float32)
            hs_ref[pl.ds(n, pad), :] = z
            ht_ref[pl.ds(n, pad), :] = z
            us_ref[pl.ds(n, pad), :] = z   # zero inv rows => padded anchors add 0
            ut_ref[pl.ds(n, pad), :] = z

        def body(c, acc):
            i0 = c * ca
            sg = packed_grams(hs_ref[pl.ds(i0, ca), :],
                              us_ref[pl.ds(i0, ca), :], c_s)
            tg = packed_grams(ht_ref[pl.ds(i0, ca), :],
                              ut_ref[pl.ds(i0, ca), :], c_t)
            return acc + huber_sum(sg, tg)

        angle_sum = lax.fori_loop(0, num_chunks, body, jnp.zeros((), jnp.float32),
                                  unroll=min(num_chunks, 2))

    angle_loss = angle_sum * jnp.float32(1.0 / (n * n * n))  # mean over N^3

    out_ref[0, 0] = (dist_loss * jnp.float32(alpha_1)
                     + angle_loss * jnp.float32(alpha_2))


def rkd_loss(f_s, f_t, out_student=None, out_teacher=None, targets=None,
             alpha_1=10.0, alpha_2=10.0):
    """Forward pass of RKD(x=alpha_1, y=alpha_2)."""
    s = f_s[-1]
    t = f_t[-1]
    assert s.ndim == 2 and t.shape == s.shape and s.shape[0] >= 2
    n, c = s.shape
    nn = n * n

    # Zero-pad channels to a multiple of 128 lanes: full-width, unmasked MXU/VPU
    # work; zero padding changes neither dot products nor norms.
    pad_c = (-c) % 128
    if pad_c:
        s = jnp.pad(s, ((0, 0), (0, pad_c)))
        t = jnp.pad(t, ((0, 0), (0, pad_c)))
    cp = c + pad_c

    # Anchors per chunk for the (chunk, n*n)-packed angle phase: keep each
    # working tile around <=128K f32 elements; whole batch for small problems.
    ca = max(1, min(n, (128 * 1024) // nn))
    if ca > 8:
        ca = (ca // 8) * 8                 # sublane-aligned chunk rows
    num_chunks = pl.cdiv(n, ca)
    n_pad = num_chunks * ca

    kernel = functools.partial(_rkd_kernel, n=n, ca=ca, num_chunks=num_chunks,
                               alpha_1=float(alpha_1), alpha_2=float(alpha_2))

    scratch_shapes = []
    if num_chunks > 1:
        scratch_shapes = [pltpu.VMEM((n_pad, n), jnp.float32) for _ in range(4)]

    # Rough VMEM working-set estimate; only override the default scoped limit
    # when the problem is big enough to need it (matters on v7x: 64 MiB VMEM).
    vmem_bytes = 4 * (2 * n * cp            # s, t
                      + 4 * n_pad * n       # scratch (if any)
                      + 4 * n * nn          # R, T, h@T temporaries
                      + 12 * ca * nn        # packed working tiles
                      + 10 * n * n)         # (n, n) intermediates
    compiler_params = None
    if vmem_bytes > 12 * 1024 * 1024:
        compiler_params = pltpu.CompilerParams(
            vmem_limit_bytes=int(min(2 * vmem_bytes, 64 * 1024 * 1024)))

    out = pl.pallas_call(
        kernel,
        out_shape=jax.ShapeDtypeStruct((1, 1), jnp.float32),
        in_specs=[
            pl.BlockSpec(memory_space=pltpu.MemorySpace.VMEM),
            pl.BlockSpec(memory_space=pltpu.MemorySpace.VMEM),
        ],
        out_specs=pl.BlockSpec(memory_space=pltpu.MemorySpace.SMEM),
        scratch_shapes=scratch_shapes,
        compiler_params=compiler_params,
    )(s, t)
    return out[0, 0]


# ---- pure-JAX reference (for correctness check only) ----
def _rkd_ref(s, t, alpha_1=10.0, alpha_2=10.0):
    eps = 1e-12
    n = s.shape[0]

    def pdist(e):
        sq = jnp.sum(e * e, axis=1)
        prod = e @ e.T
        res = jnp.sqrt(jnp.maximum(sq[:, None] + sq[None, :] - 2.0 * prod, eps))
        return res * (1.0 - jnp.eye(n, dtype=res.dtype))

    def smooth_l1_sum(a, b):
        d = jnp.abs(a - b)
        return jnp.sum(jnp.where(d < 1.0, 0.5 * d * d, d - 0.5))

    def pos_mean(d):
        m = d > 0
        return jnp.sum(jnp.where(m, d, 0.0)) / jnp.sum(m)

    t_d = pdist(t)
    s_d = pdist(s)
    dist_loss = smooth_l1_sum(s_d / pos_mean(s_d), t_d / pos_mean(t_d)) / n

    def angles(e):
        d = e[None, :, :] - e[:, None, :]  # d[i, j] = e[j] - e[i]
        nrm = jnp.sqrt(jnp.sum(d * d, axis=2, keepdims=True))
        dn = d / jnp.maximum(nrm, eps)
        return jnp.einsum("ijc,ikc->ijk", dn, dn)

    d = jnp.abs(angles(s) - angles(t))
    angle_loss = jnp.mean(jnp.where(d < 1.0, 0.5 * d * d, d - 0.5))
    return dist_loss * alpha_1 + angle_loss * alpha_2


if __name__ == "__main__":
    key = jax.random.PRNGKey(0)
    k1, k2, k3, k4 = jax.random.split(key, 4)
    N, C = 8, 32
    # f_s / f_t are lists of features; only the last (N, C) entry is used.
    f_s = [jax.random.normal(k3, (N, 64), jnp.float32),
           jax.random.normal(k1, (N, C), jnp.float32)]
    f_t = [jax.random.normal(k4, (N, 64), jnp.float32),
           jax.random.normal(k2, (N, C), jnp.float32)]
    out_student = jnp.zeros((N, 10), jnp.float32)   # unused by forward
    out_teacher = jnp.zeros((N, 10), jnp.float32)   # unused by forward
    targets = jnp.zeros((N,), jnp.int32)            # unused by forward

    loss = rkd_loss(f_s, f_t, out_student, out_teacher, targets,
                    alpha_1=10.0, alpha_2=10.0)
    loss = jax.block_until_ready(loss)

    ref = _rkd_ref(f_s[-1], f_t[-1], 10.0, 10.0)
    assert jnp.allclose(loss, ref, rtol=1e-4, atol=1e-4), (loss, ref)
    print("KERNEL_OK")
</pallas_src>

<mosaic_0001>
module attributes {stable_mosaic.version = 11 : i64} {
  func.func @_rkd_kernel(%arg0: memref<8x128xf32, #tpu.memory_space<vmem>>, %arg1: memref<8x128xf32, #tpu.memory_space<vmem>>, %arg2: memref<1x1xf32, #tpu.memory_space<smem>>) attributes {dimension_semantics = [], scalar_prefetch = 0 : i64, scratch_operands = 0 : i64, tpu.core_type = #tpu.core_type<tc>} {
    %c0 = arith.constant 0 : index
    %c0_0 = arith.constant 0 : index
    %0 = vector.load %arg0[%c0, %c0_0] : memref<8x128xf32, #tpu.memory_space<vmem>>, vector<8x128xf32>
    %cst = arith.constant dense<0.000000e+00> : vector<8x8xf32>
    %1 = tpu.matmul %0, %0, %cst {dimension_numbers = #tpu.dot_dimension_numbers<[1], [1], [0], [0], [0, 0, 1, 0], [], []>} : vector<8x128xf32>, vector<8x128xf32>, vector<8x8xf32> -> vector<8x8xf32>
    %c0_1 = arith.constant 0 : index
    %c0_2 = arith.constant 0 : index
    %2 = vector.load %arg1[%c0_1, %c0_2] : memref<8x128xf32, #tpu.memory_space<vmem>>, vector<8x128xf32>
    %cst_3 = arith.constant dense<0.000000e+00> : vector<8x8xf32>
    %3 = tpu.matmul %2, %2, %cst_3 {dimension_numbers = #tpu.dot_dimension_numbers<[1], [1], [0], [0], [0, 0, 1, 0], [], []>} : vector<8x128xf32>, vector<8x128xf32>, vector<8x8xf32> -> vector<8x8xf32>
    %4 = tpu.iota {dimensions = array<i32: 0>} : vector<8x8xi32>
    %5 = tpu.iota {dimensions = array<i32: 1>} : vector<8x8xi32>
    %6 = arith.cmpi eq, %4, %5 : vector<8x8xi32>
    %cst_4 = arith.constant 0.000000e+00 : f32
    %7 = vector.broadcast %cst_4 : f32 to vector<8x8xf32>
    %8 = arith.select %6, %1, %7 : vector<8x8xi1>, vector<8x8xf32>
    %cst_5 = arith.constant dense<0.000000e+00> : vector<8xf32>
    %9 = vector.multi_reduction <add>, %8, %cst_5 [1] : vector<8x8xf32> to vector<8xf32>
    %10 = vector.shape_cast %9 : vector<8xf32> to vector<8x1xf32>
    %cst_6 = arith.constant dense<0.000000e+00> : vector<8xf32>
    %11 = vector.multi_reduction <add>, %8, %cst_6 [0] : vector<8x8xf32> to vector<8xf32>
    %12 = vector.shape_cast %11 : vector<8xf32> to vector<1x8xf32>
    %13 = vector.broadcast %10 : vector<8x1xf32> to vector<8x8xf32>
    %14 = vector.broadcast %12 : vector<1x8xf32> to vector<8x8xf32>
    %15 = arith.addf %13, %14 : vector<8x8xf32>
    %cst_7 = arith.constant 2.000000e+00 : f32
    %16 = vector.broadcast %cst_7 : f32 to vector<8x8xf32>
    %17 = arith.mulf %16, %1 : vector<8x8xf32>
    %18 = arith.subf %15, %17 : vector<8x8xf32>
    %cst_8 = arith.constant 9.99999996E-13 : f32
    %19 = vector.broadcast %cst_8 : f32 to vector<8x8xf32>
    %20 = arith.maximumf %18, %19 : vector<8x8xf32>
    %cst_9 = arith.constant 0.000000e+00 : f32
    %21 = vector.broadcast %cst_9 : f32 to vector<8x8xf32>
    %22 = arith.select %6, %21, %20 : vector<8x8xi1>, vector<8x8xf32>
    %23 = math.sqrt %20 : vector<8x8xf32>
    %cst_10 = arith.constant 0.000000e+00 : f32
    %24 = vector.broadcast %cst_10 : f32 to vector<8x8xf32>
    %25 = arith.select %6, %24, %23 : vector<8x8xi1>, vector<8x8xf32>
    %26 = math.rsqrt %20 : vector<8x8xf32>
    %cst_11 = arith.constant 0.000000e+00 : f32
    %27 = vector.broadcast %cst_11 : f32 to vector<8x8xf32>
    %28 = arith.select %6, %27, %26 : vector<8x8xi1>, vector<8x8xf32>
    %cst_12 = arith.constant 0.000000e+00 : f32
    %29 = vector.broadcast %cst_12 : f32 to vector<8x8xf32>
    %30 = arith.select %6, %3, %29 : vector<8x8xi1>, vector<8x8xf32>
    %cst_13 = arith.constant dense<0.000000e+00> : vector<8xf32>
    %31 = vector.multi_reduction <add>, %30, %cst_13 [1] : vector<8x8xf32> to vector<8xf32>
    %32 = vector.shape_cast %31 : vector<8xf32> to vector<8x1xf32>
    %cst_14 = arith.constant dense<0.000000e+00> : vector<8xf32>
    %33 = vector.multi_reduction <add>, %30, %cst_14 [0] : vector<8x8xf32> to vector<8xf32>
    %34 = vector.shape_cast %33 : vector<8xf32> to vector<1x8xf32>
    %35 = vector.broadcast %32 : vector<8x1xf32> to vector<8x8xf32>
    %36 = vector.broadcast %34 : vector<1x8xf32> to vector<8x8xf32>
    %37 = arith.addf %35, %36 : vector<8x8xf32>
    %cst_15 = arith.constant 2.000000e+00 : f32
    %38 = vector.broadcast %cst_15 : f32 to vector<8x8xf32>
    %39 = arith.mulf %38, %3 : vector<8x8xf32>
    %40 = arith.subf %37, %39 : vector<8x8xf32>
    %cst_16 = arith.constant 9.99999996E-13 : f32
    %41 = vector.broadcast %cst_16 : f32 to vector<8x8xf32>
    %42 = arith.maximumf %40, %41 : vector<8x8xf32>
    %cst_17 = arith.constant 0.000000e+00 : f32
    %43 = vector.broadcast %cst_17 : f32 to vector<8x8xf32>
    %44 = arith.select %6, %43, %42 : vector<8x8xi1>, vector<8x8xf32>
    %45 = math.sqrt %42 : vector<8x8xf32>
    %cst_18 = arith.constant 0.000000e+00 : f32
    %46 = vector.broadcast %cst_18 : f32 to vector<8x8xf32>
    %47 = arith.select %6, %46, %45 : vector<8x8xi1>, vector<8x8xf32>
    %48 = math.rsqrt %42 : vector<8x8xf32>
    %cst_19 = arith.constant 0.000000e+00 : f32
    %49 = vector.broadcast %cst_19 : f32 to vector<8x8xf32>
    %50 = arith.select %6, %49, %48 : vector<8x8xi1>, vector<8x8xf32>
    %51 = vector.shape_cast %25 : vector<8x8xf32> to vector<1x8x8xf32>
    %cst_20 = arith.constant dense<0.000000e+00> : vector<1xf32>
    %52 = vector.multi_reduction <add>, %51, %cst_20 [1, 2] : vector<1x8x8xf32> to vector<1xf32>
    %53 = vector.shape_cast %52 : vector<1xf32> to vector<1x1x1xf32>
    %54 = vector.extract %53[0, 0, 0] : f32 from vector<1x1x1xf32>
    %cst_21 = arith.constant 0.0178571437 : f32
    %55 = arith.mulf %54, %cst_21 : f32
    %cst_22 = arith.constant 1.000000e+00 : f32
    %56 = arith.divf %cst_22, %55 : f32
    %57 = vector.broadcast %56 : f32 to vector<8x8xf32>
    %58 = arith.mulf %25, %57 : vector<8x8xf32>
    %59 = vector.shape_cast %47 : vector<8x8xf32> to vector<1x8x8xf32>
    %cst_23 = arith.constant dense<0.000000e+00> : vector<1xf32>
    %60 = vector.multi_reduction <add>, %59, %cst_23 [1, 2] : vector<1x8x8xf32> to vector<1xf32>
    %61 = vector.shape_cast %60 : vector<1xf32> to vector<1x1x1xf32>
    %62 = vector.extract %61[0, 0, 0] : f32 from vector<1x1x1xf32>
    %cst_24 = arith.constant 0.0178571437 : f32
    %63 = arith.mulf %62, %cst_24 : f32
    %cst_25 = arith.constant 1.000000e+00 : f32
    %64 = arith.divf %cst_25, %63 : f32
    %65 = vector.broadcast %64 : f32 to vector<8x8xf32>
    %66 = arith.mulf %47, %65 : vector<8x8xf32>
    %67 = arith.subf %58, %66 : vector<8x8xf32>
    %68 = math.absf %67 : vector<8x8xf32>
    %cst_26 = arith.constant 1.000000e+00 : f32
    %69 = vector.broadcast %cst_26 : f32 to vector<8x8xf32>
    %70 = arith.minimumf %68, %69 : vector<8x8xf32>
    %cst_27 = arith.constant 5.000000e-01 : f32
    %71 = vector.broadcast %cst_27 : f32 to vector<8x8xf32>
    %72 = arith.mulf %71, %70 : vector<8x8xf32>
    %73 = arith.subf %68, %72 : vector<8x8xf32>
    %74 = arith.mulf %70, %73 : vector<8x8xf32>
    %75 = vector.shape_cast %74 : vector<8x8xf32> to vector<1x8x8xf32>
    %cst_28 = arith.constant dense<0.000000e+00> : vector<1xf32>
    %76 = vector.multi_reduction <add>, %75, %cst_28 [1, 2] : vector<1x8x8xf32> to vector<1xf32>
    %77 = vector.shape_cast %76 : vector<1xf32> to vector<1x1x1xf32>
    %78 = vector.extract %77[0, 0, 0] : f32 from vector<1x1x1xf32>
    %cst_29 = arith.constant 1.250000e-01 : f32
    %79 = arith.mulf %78, %cst_29 : f32
    %cst_30 = arith.constant 5.000000e-01 : f32
    %80 = vector.broadcast %cst_30 : f32 to vector<8x8xf32>
    %81 = arith.mulf %80, %22 : vector<8x8xf32>
    %cst_31 = arith.constant 5.000000e-01 : f32
    %82 = vector.broadcast %cst_31 : f32 to vector<8x8xf32>
    %83 = arith.mulf %82, %44 : vector<8x8xf32>
    %84 = tpu.iota {dimensions = array<i32: 0>} : vector<8x64xi32>
    %85 = tpu.iota {dimensions = array<i32: 1>} : vector<8x64xi32>
    %c8_i32 = arith.constant 8 : i32
    %86 = vector.broadcast %c8_i32 : i32 to vector<8x64xi32>
    %87 = arith.muli %84, %86 : vector<8x64xi32>
    %88 = arith.cmpi sge, %85, %87 : vector<8x64xi32>
    %c8_i32_32 = arith.constant 8 : i32
    %89 = vector.broadcast %c8_i32_32 : i32 to vector<8x64xi32>
    %90 = arith.addi %87, %89 : vector<8x64xi32>
    %91 = arith.cmpi slt, %85, %90 : vector<8x64xi32>
    %92 = arith.andi %88, %91 : vector<8x64xi1>
    %93 = arith.extui %92 : vector<8x64xi1> to vector<8x64xi32>
    %94 = arith.sitofp %93 : vector<8x64xi32> to vector<8x64xf32>
    %95 = arith.sitofp %84 : vector<8x64xi32> to vector<8x64xf32>
    %cst_33 = arith.constant 0.000000e+00 : f32
    %96 = vector.broadcast %cst_33 : f32 to vector<8x64xf32>
    %97 = arith.select %92, %95, %96 : vector<8x64xi1>, vector<8x64xf32>
    %cst_34 = arith.constant dense<0.000000e+00> : vector<64xf32>
    %98 = vector.multi_reduction <add>, %97, %cst_34 [0] : vector<8x64xf32> to vector<64xf32>
    %99 = vector.shape_cast %98 : vector<64xf32> to vector<1x64xf32>
    %100 = tpu.iota {dimensions = array<i32: 1>} : vector<1x64xi32>
    %101 = arith.sitofp %100 : vector<1x64xi32> to vector<1x64xf32>
    %cst_35 = arith.constant 8.000000e+00 : f32
    %102 = vector.broadcast %cst_35 : f32 to vector<1x64xf32>
    %103 = arith.mulf %99, %102 : vector<1x64xf32>
    %104 = arith.subf %101, %103 : vector<1x64xf32>
    %105 = vector.broadcast %104 : vector<1x64xf32> to vector<8x64xf32>
    %106 = arith.cmpf oeq, %95, %105 : vector<8x64xf32>
    %107 = arith.extui %106 : vector<8x64xi1> to vector<8x64xi32>
    %108 = arith.sitofp %107 : vector<8x64xi32> to vector<8x64xf32>
    %cst_36 = arith.constant dense<0.000000e+00> : vector<8x64xf32>
    %109 = tpu.matmul %81, %108, %cst_36 {dimension_numbers = #tpu.dot_dimension_numbers<[1], [0], [0], [1], [0, 0, 1, 1], [], []>} : vector<8x8xf32>, vector<8x64xf32>, vector<8x64xf32> -> vector<8x64xf32>
    %110 = arith.mulf %94, %109 : vector<8x64xf32>
    %cst_37 = arith.constant dense<0.000000e+00> : vector<64xf32>
    %111 = vector.multi_reduction <add>, %110, %cst_37 [0] : vector<8x64xf32> to vector<64xf32>
    %112 = vector.shape_cast %111 : vector<64xf32> to vector<1x64xf32>
    %cst_38 = arith.constant dense<0.000000e+00> : vector<8x64xf32>
    %113 = tpu.matmul %83, %108, %cst_38 {dimension_numbers = #tpu.dot_dimension_numbers<[1], [0], [0], [1], [0, 0, 1, 1], [], []>} : vector<8x8xf32>, vector<8x64xf32>, vector<8x64xf32> -> vector<8x64xf32>
    %114 = arith.mulf %94, %113 : vector<8x64xf32>
    %cst_39 = arith.constant dense<0.000000e+00> : vector<64xf32>
    %115 = vector.multi_reduction <add>, %114, %cst_39 [0] : vector<8x64xf32> to vector<64xf32>
    %116 = vector.shape_cast %115 : vector<64xf32> to vector<1x64xf32>
    %cst_40 = arith.constant dense<0.000000e+00> : vector<8x64xf32>
    %117 = tpu.matmul %81, %94, %cst_40 {dimension_numbers = #tpu.dot_dimension_numbers<[1], [0], [0], [1], [0, 0, 1, 1], [], []>} : vector<8x8xf32>, vector<8x64xf32>, vector<8x64xf32> -> vector<8x64xf32>
    %cst_41 = arith.constant dense<0.000000e+00> : vector<8x64xf32>
    %118 = tpu.matmul %81, %108, %cst_41 {dimension_numbers = #tpu.dot_dimension_numbers<[1], [0], [0], [1], [0, 0, 1, 1], [], []>} : vector<8x8xf32>, vector<8x64xf32>, vector<8x64xf32> -> vector<8x64xf32>
    %cst_42 = arith.constant dense<0.000000e+00> : vector<8x64xf32>
    %119 = tpu.matmul %28, %94, %cst_42 {dimension_numbers = #tpu.dot_dimension_numbers<[1], [0], [0], [1], [0, 0, 1, 1], [], []>} : vector<8x8xf32>, vector<8x64xf32>, vector<8x64xf32> -> vector<8x64xf32>
    %cst_43 = arith.constant dense<0.000000e+00> : vector<8x64xf32>
    %120 = tpu.matmul %28, %108, %cst_43 {dimension_numbers = #tpu.dot_dimension_numbers<[1], [0], [0], [1], [0, 0, 1, 1], [], []>} : vector<8x8xf32>, vector<8x64xf32>, vector<8x64xf32> -> vector<8x64xf32>
    %121 = arith.addf %117, %118 : vector<8x64xf32>
    %122 = vector.broadcast %112 : vector<1x64xf32> to vector<8x64xf32>
    %123 = arith.subf %121, %122 : vector<8x64xf32>
    %124 = arith.mulf %119, %120 : vector<8x64xf32>
    %125 = arith.mulf %123, %124 : vector<8x64xf32>
    %cst_44 = arith.constant dense<0.000000e+00> : vector<8x64xf32>
    %126 = tpu.matmul %83, %94, %cst_44 {dimension_numbers = #tpu.dot_dimension_numbers<[1], [0], [0], [1], [0, 0, 1, 1], [], []>} : vector<8x8xf32>, vector<8x64xf32>, vector<8x64xf32> -> vector<8x64xf32>
    %cst_45 = arith.constant dense<0.000000e+00> : vector<8x64xf32>
    %127 = tpu.matmul %83, %108, %cst_45 {dimension_numbers = #tpu.dot_dimension_numbers<[1], [0], [0], [1], [0, 0, 1, 1], [], []>} : vector<8x8xf32>, vector<8x64xf32>, vector<8x64xf32> -> vector<8x64xf32>
    %cst_46 = arith.constant dense<0.000000e+00> : vector<8x64xf32>
    %128 = tpu.matmul %50, %94, %cst_46 {dimension_numbers = #tpu.dot_dimension_numbers<[1], [0], [0], [1], [0, 0, 1, 1], [], []>} : vector<8x8xf32>, vector<8x64xf32>, vector<8x64xf32> -> vector<8x64xf32>
    %cst_47 = arith.constant dense<0.000000e+00> : vector<8x64xf32>
    %129 = tpu.matmul %50, %108, %cst_47 {dimension_numbers = #tpu.dot_dimension_numbers<[1], [0], [0], [1], [0, 0, 1, 1], [], []>} : vector<8x8xf32>, vector<8x64xf32>, vector<8x64xf32> -> vector<8x64xf32>
    %130 = arith.addf %126, %127 : vector<8x64xf32>
    %131 = vector.broadcast %116 : vector<1x64xf32> to vector<8x64xf32>
    %132 = arith.subf %130, %131 : vector<8x64xf32>
    %133 = arith.mulf %128, %129 : vector<8x64xf32>
    %134 = arith.mulf %132, %133 : vector<8x64xf32>
    %135 = arith.subf %125, %134 : vector<8x64xf32>
    %136 = math.absf %135 : vector<8x64xf32>
    %cst_48 = arith.constant 1.000000e+00 : f32
    %137 = vector.broadcast %cst_48 : f32 to vector<8x64xf32>
    %138 = arith.minimumf %136, %137 : vector<8x64xf32>
    %cst_49 = arith.constant 5.000000e-01 : f32
    %139 = vector.broadcast %cst_49 : f32 to vector<8x64xf32>
    %140 = arith.mulf %139, %138 : vector<8x64xf32>
    %141 = arith.subf %136, %140 : vector<8x64xf32>
    %142 = arith.mulf %138, %141 : vector<8x64xf32>
    %143 = vector.shape_cast %142 : vector<8x64xf32> to vector<1x8x64xf32>
    %cst_50 = arith.constant dense<0.000000e+00> : vector<1xf32>
    %144 = vector.multi_reduction <add>, %143, %cst_50 [1, 2] : vector<1x8x64xf32> to vector<1xf32>
    %145 = vector.shape_cast %144 : vector<1xf32> to vector<1x1x1xf32>
    %146 = vector.extract %145[0, 0, 0] : f32 from vector<1x1x1xf32>
    %cst_51 = arith.constant 0.001953125 : f32
    %147 = arith.mulf %146, %cst_51 : f32
    %cst_52 = arith.constant 1.000000e+01 : f32
    %148 = arith.mulf %79, %cst_52 : f32
    %cst_53 = arith.constant 1.000000e+01 : f32
    %149 = arith.mulf %147, %cst_53 : f32
    %150 = arith.addf %148, %149 : f32
    %c0_54 = arith.constant 0 : index
    %c0_55 = arith.constant 0 : index
    %151 = memref.load %arg2[%c0_54, %c0_55] : memref<1x1xf32, #tpu.memory_space<smem>>
    memref.store %150, %arg2[%c0_54, %c0_55] : memref<1x1xf32, #tpu.memory_space<smem>>
    return
  }
}

</mosaic_0001>

<bundles_post_ra>
// kernel: tpu_custom_call.1
= control target key start
LH: loop header
LB: loop body
LE: loop exit
PB: predicated region body
PF: predicated region fallthrough
CT: control target
= control target key end

     0   :  { %7 = vsyncpa [#allocation3], 0  ;;  %s1282_s0 = inlined_call_operand.hbm [shape: f32[8,128], index: 0, kind: input, shape index: {}]   ;;  %s1283_s1 = inlined_call_operand.hbm [shape: f32[8,128], index: 1, kind: input, shape index: {}]   ;;  %s1284_s2 = inlined_call_operand.hbm [shape: f32[1,1], index: 2, kind: output, shape index: {}]  }
   0x1   :  { %8 = vsyncpa [#allocation6], 0 }
   0x2   :  { %9 = vsyncpa [#allocation4], 0  ;;  %s1113_s9 = smov [#allocation2]   ;;  %s1114_s11 = smov [#allocation5]  }
   0x3   :  { %s16_s10 = sshll.u32 %s1113_s9, 4  ;;  %s26_s12 = sshll.u32 %s1114_s11, 4  ;;  %s17_s10 = int_to_ptr.vmem [resolvable:$true] %s16_s10  ;;  %s27_s12 = int_to_ptr.vmem [resolvable:$true] %s26_s12 }
   0x4   :  { %s1053_s15 = scalar_lea.hbm %s1282_s0, 128 }
   0x5   :  { %p1054_p0 = scmp.ne.s32.totalorder %s1282_s0, %s1053_s15  ;;  %p1057_p1 = scmp.lt.u32.totalorder %s1053_s15, %s1282_s0 }
   0x7   :  { %p1059_p2 = pnand %p1057_p1, %p1054_p0 }
   0x9   :  { %1062 = shalt.err (!%p1059_p2)
}
   0xa   :  { %s1063_s20 = scalar_lea.vmem %s17_s10, 128  ;;  %p1068_p4 = scmp.lt.s32.totalorder %s17_s10, %s17_s10 }
   0xb   :  { %p1064_p3 = scmp.ne.s32.totalorder %s17_s10, %s1063_s20  ;;  %p1069_p5 = scmp.lt.s32.totalorder %s1063_s20, %s1063_s20 }
   0xd   :  { %p1070_p6 = por %p1069_p5, %p1068_p4 }
   0xf   :  { %p1071_p7 = pnand %p1070_p6, %p1064_p3 }
  0x11   :  { %1074 = shalt.err (!%p1071_p7)
}
  0x12   :  { %19 = dma.hbm_to_vmem [thread:$0]  %s1282_s0, 128, %s17_s10, [#allocation3]  }
  0x13   :  { %s1075_s25 = scalar_lea.hbm %s1283_s1, 128 }
  0x14   :  { %p1076_p8 = scmp.ne.s32.totalorder %s1283_s1, %s1075_s25  ;;  %p1079_p9 = scmp.lt.u32.totalorder %s1075_s25, %s1283_s1 }
  0x16   :  { %p1081_p10 = pnand %p1079_p9, %p1076_p8 }
  0x18   :  { %1084 = shalt.err (!%p1081_p10)
}
  0x19   :  { %s1085_s30 = scalar_lea.vmem %s27_s12, 128  ;;  %p1090_p12 = scmp.lt.s32.totalorder %s27_s12, %s27_s12 }
  0x1a   :  { %p1086_p11 = scmp.ne.s32.totalorder %s27_s12, %s1085_s30  ;;  %p1091_p13 = scmp.lt.s32.totalorder %s1085_s30, %s1085_s30 }
  0x1c   :  { %p1092_p0 = por %p1091_p13, %p1090_p12 }
  0x1e   :  { %p1093_p1 = pnand %p1092_p0, %p1086_p11 }
  0x20   :  { %1096 = shalt.err (!%p1093_p1)
}
  0x21   :  { %29 = dma.hbm_to_vmem [thread:$0]  %s1283_s1, 128, %s27_s12, [#allocation6]  }
  0x22   :  { %1107 = dma.done.wait [#allocation3], 128  }
  0x23   :  { %1108 = vsyncadd [#allocation3], 4294967168 }
  0x24   :  { %1109 = dma.done.wait [#allocation6], 128  }
  0x25   :  { %1110 = vsyncadd [#allocation6], 4294967168  ;;  %v1115_v0 = vmov 0.0   ;;  %vm1116_vm0 = vmmov 0   ;;  %v36_v1 = vld [vmem:[#allocation2] sm:$0xff]  ;;  %v107_v2 = vld [vmem:[#allocation5] sm:$0xff]  ;;  %v178_v3 = vlaneseq }
  0x26   :  { %977 = vmatprep.subr.mxu0 %v1115_v0  ;;  %979 = vmatprep.mubr.msk.f32.mxu0 %vm1116_vm0, %v1115_v0  ;;  %vm184_vm2 = vcmask 64512   ;;  %vm294_vm6 = vcmask 523264   ;;  %v1117_v31 = vmov 1.0   ;;  %s1097_s18 = scalar_lea.hbm %s1284_s2, 16 }
  0x27   :  { %982 = vmatprep.subr.mxu1 %v1115_v0  ;;  %984 = vmatprep.mubr.msk.f32.mxu1 %vm1116_vm0, %v1115_v0  ;;  %v179_v4 = vshrl.u32 %v178_v3, 7  ;;  %v181_v5 = vand.u32 127, %v178_v3  ;;  %p1098_p2 = scmp.ne.s32.totalorder %s1284_s2, %s1097_s18  ;;  %p1101_p3 = scmp.lt.u32.totalorder %s1097_s18, %s1284_s2 }
  0x28   :  { %978 = vmatpush3.xpose.msra.mxu0 %v36_v1  ;;  %983 = vmatpush3.xpose.msra.mxu1 %v107_v2 }
  0x29   :  { %987 = vmatprep.subr.mxu0 %v1115_v0  ;;  %992 = vmatprep.subr.mxu1 %v1115_v0  ;;  %vm1170_vm1 = vcmp.eq.s32.totalorder %v179_v4, %v181_v5  ;;  %v285_v9 = vmul.u32 8, %v179_v4  ;;  %v292_v17 = vcvt.s32.f32 %v179_v4  ;;  %v302_v27 = vcvt.s32.f32 %v181_v5  ;;  %p1103_p4 = pnand %p1101_p3, %p1098_p2 }
  0x2b   :  { %980 = vmatmul.mubr.f32.vlgmr.msra.gmra.mrb[0].mxu0 %v36_v1  ;;  %985 = vmatmul.mubr.f32.vlgmr.msra.gmra.mrb[0].mxu1 %v107_v2  ;;  %v287_v15 = vadd.s32 8, %v285_v9  ;;  %vm286_vm3 = vcmp.ge.s32.totalorder %v181_v5, %v285_v9 }
  0x2c   :  { %989 = vmatprep.mubr.msk.f32.mxu0 %vm1116_vm0, %v1115_v0  ;;  %994 = vmatprep.mubr.msk.f32.mxu1 %vm1116_vm0, %v1115_v0 }
  0x2d   :  { %vm288_vm4 = vcmp.lt.s32.totalorder %v181_v5, %v287_v15 }
  0x2e   :  { %vm1180_vm5 = vmand %vm286_vm3, %vm288_vm4 }
  0x2f   :  { %v293_v19 = vsel %vm1180_vm5, %v292_v17, 0.0  ;;  %v939_v6 = vsel %vm1180_vm5, 1.0, %v1115_v0 }
  0x30   :  { %v295_v20 = vsel %vm294_vm6, %v293_v19, 0.0 }
  0x31   :  { %v296_v21 = vrot.slane %v295_v20, 4 }
  0x33   :  { %v297_v22 = vadd.f32 %v296_v21, %v295_v20 }
  0x35   :  { %v298_v23 = vrot.slane %v297_v22, 2 }
  0x37   :  { %v299_v24 = vadd.f32 %v298_v23, %v297_v22 }
  0x39   :  { %v300_v25 = vrot.slane %v299_v24, 1 }
  0x3b   :  { %v301_v26 = vadd.f32 %v300_v25, %v299_v24 }
  0x3d   :  { %v303_v28 = vmul.f32 8.0, %v301_v26 }
  0x3f   :  { %v304_v29 = vsub.f32 %v302_v27, %v303_v28 }
  0x41   :  { %vm1187_vm7 = vcmp.eq.f32.partialorder %v292_v17, %v304_v29 }
  0x42   :  { %988 = vmatpush3.msk.msra.mxu0 %vm1187_vm7, %v1117_v31  ;;  %993 = vmatpush3.msk.msra.mxu1 %vm1187_vm7, %v1117_v31 }
  0x43   :  { %997 = vmatprep.subr.mxu0 %v1115_v0  ;;  %1002 = vmatprep.subr.mxu1 %v1115_v0 }
  0xfe   :  { %v103_v7 = vpop.f32.mrb[0].mxu0  ;;  %v174_v8 = vpop.f32.mrb[0].mxu1 }
  0xff   :  { %v183_v10 = vsel %vm1170_vm1, %v103_v7, 0.0  ;;  %v981_v11 = vpop.f32.mrb[1].mxu0  ;;  %v209_v12 = vsel %vm1170_vm1, %v174_v8, 0.0  ;;  %v986_v13 = vpop.f32.mrb[1].mxu1  ;;  %v195_v44 = vmul.f32 2.0, %v103_v7  ;;  %v220_v49 = vmul.f32 2.0, %v174_v8 }
 0x100   :  { %v185_v14 = vsel %vm184_vm2, %v183_v10, 0.0  ;;  %v210_v16 = vsel %vm184_vm2, %v209_v12, 0.0 }
 0x101   :  { %186 = vadd.xlane.f32.xlu0 %v185_v14  ;;  %v188_v32 = vrot.slane %v185_v14, 4  ;;  %v213_v34 = vrot.slane %v210_v16, 4 }
 0x103   :  { %v189_v33 = vadd.f32 %v188_v32, %v185_v14  ;;  %v214_v36 = vadd.f32 %v213_v34, %v210_v16 }
 0x105   :  { %211 = vadd.xlane.f32.xlu0 %v210_v16  ;;  %v190_v35 = vrot.slane %v189_v33, 2  ;;  %v215_v37 = vrot.slane %v214_v36, 2 }
 0x107   :  { %v191_v38 = vadd.f32 %v190_v35, %v189_v33  ;;  %v216_v40 = vadd.f32 %v215_v37, %v214_v36 }
 0x109   :  { %v192_v39 = vrot.slane %v191_v38, 1  ;;  %v217_v42 = vrot.slane %v216_v40, 1 }
 0x10b   :  { %v193_v41 = vadd.f32 %v192_v39, %v191_v38  ;;  %v218_v47 = vadd.f32 %v217_v42, %v216_v40 }
 0x18e   :  { %v187_v43 = vpop.xlane.xlu0 %186 }
 0x18f   :  { %v194_v45 = vadd.f32 %v193_v41, %v187_v43 }
 0x191   :  { %v196_v46 = vsub.f32 %v194_v45, %v195_v44 }
 0x192   :  { %v212_v48 = vpop.xlane.xlu0 %211 }
 0x193   :  { %v197_v50 = vmax.f32 %v196_v46, 1e-12  ;;  %v219_v51 = vadd.f32 %v218_v47, %v212_v48 }
 0x195   :  { %v221_v52 = vsub.f32 %v219_v51, %v220_v49  ;;  %v198_v53 = vsel %vm1170_vm1, 0.0, %v197_v50  ;;  %1045 = vrsqrt.f32 %v197_v50  ;;  %vm201_vm8 = vcmp.eq.f32.partialorder %v197_v50, inf }
 0x196   :  { %v283_v54 = vmul.f32 0.5, %v198_v53  ;;  %v204_v61 = vand.u32 2147483648, %v197_v50  ;;  %vm203_vm9 = vcmp.eq.f32.partialorder %v197_v50, 0.0 }
 0x197   :  { %v222_v55 = vmax.f32 %v221_v52, 1e-12 }
 0x198   :  { %990 = vmatmul.mubr.msk.f32.vlgmr.msra.gmra.mrb[2].mxu0 %vm184_vm2, %v283_v54 }
 0x199   :  { %v223_v56 = vsel %vm1170_vm1, 0.0, %v222_v55  ;;  %998 = vmatpush3.msk.msra.mxu0 %vm1180_vm5, %v1117_v31  ;;  %999 = vmatprep.mubr.msk.f32.mxu0 %vm1116_vm0, %v1115_v0  ;;  %1047 = vrsqrt.f32 %v222_v55  ;;  %vm226_vm10 = vcmp.eq.f32.partialorder %v222_v55, inf  ;;  %v229_v7 = vand.u32 2147483648, %v222_v55 }
 0x19a   :  { %v284_v57 = vmul.f32 0.5, %v223_v56  ;;  %1007 = vmatprep.subr.mxu0 %v1115_v0  ;;  %vm228_vm11 = vcmp.eq.f32.partialorder %v222_v55, 0.0 }
 0x19c   :  { %995 = vmatmul.mubr.msk.f32.vlgmr.msra.gmra.mrb[2].mxu1 %vm184_vm2, %v284_v57 }
 0x19d   :  { %1003 = vmatpush3.msk.msra.mxu1 %vm1187_vm7, %v1117_v31  ;;  %1004 = vmatprep.mubr.msk.f32.mxu1 %vm1116_vm0, %v1115_v0 }
 0x19e   :  { %1012 = vmatprep.subr.mxu1 %v1115_v0 }
 0x19f   :  { %v1046_v58 = vpop.eup %1045 }
 0x1a0   :  { %v208_v59 = vsel %vm1170_vm1, 0.0, %v1046_v58  ;;  %v200_v60 = vmul.f32 %v1046_v58, %v197_v50 }
 0x1a1   :  { %1000 = vmatmul.mubr.msk.f32.vlgmr.msra.gmra.mrb[4].mxu0 %vm184_vm2, %v208_v59  ;;  %1005 = vmatmul.mubr.msk.f32.vlgmr.msra.gmra.mrb[4].mxu1 %vm184_vm2, %v208_v59 }
 0x1a2   :  { %1008 = vmatpush3.msk.msra.mxu0 %vm1180_vm5, %v1117_v31  ;;  %1009 = vmatprep.mubr.msk.f32.mxu0 %vm1116_vm0, %v1115_v0  ;;  %v202_v62 = vsel %vm201_vm8, %v197_v50, %v200_v60 }
 0x1a3   :  { %v1048_v63 = vpop.eup %1047  ;;  %1013 = vmatpush3.msk.msra.mxu1 %vm1180_vm5, %v1117_v31  ;;  %1014 = vmatprep.mubr.msk.f32.mxu1 %vm1116_vm0, %v1115_v0  ;;  %v205_v1 = vsel %vm203_vm9, %v204_v61, %v202_v62 }
 0x1a4   :  { %v233_v2 = vsel %vm1170_vm1, 0.0, %v1048_v63  ;;  %v1235_v3 = vsel %vm1170_vm1, 0.0, %v205_v1  ;;  %1017 = vmatprep.subr.mxu0 %v1115_v0  ;;  %1022 = vmatprep.subr.mxu1 %v1115_v0  ;;  %v225_v4 = vmul.f32 %v1048_v63, %v222_v55 }
 0x1a5   :  { %1010 = vmatmul.mubr.msk.f32.vlgmr.msra.gmra.mrb[6].mxu0 %vm184_vm2, %v283_v54  ;;  %1015 = vmatmul.mubr.msk.f32.vlgmr.msra.gmra.mrb[6].mxu1 %vm184_vm2, %v233_v2  ;;  %v234_v5 = vsel %vm184_vm2, %v1235_v3, 0.0 }
 0x1a6   :  { %235 = vadd.xlane.f32.xlu1 %v234_v5  ;;  %1018 = vmatpush3.msk.msra.mxu0 %vm1187_vm7, %v1117_v31  ;;  %v227_v8 = vsel %vm226_vm10, %v222_v55, %v225_v4 }
 0x1a7   :  { %1019 = vmatprep.mubr.msk.f32.mxu0 %vm1116_vm0, %v1115_v0  ;;  %1023 = vmatpush3.msk.msra.mxu1 %vm1180_vm5, %v1117_v31  ;;  %v230_v9 = vsel %vm228_vm11, %v229_v7, %v227_v8 }
 0x1a8   :  { %1024 = vmatprep.mubr.msk.f32.mxu1 %vm1116_vm0, %v1115_v0  ;;  %v1255_v10 = vsel %vm1170_vm1, 0.0, %v230_v9 }
 0x1a9   :  { %1020 = vmatmul.mubr.msk.f32.vlgmr.msra.gmra.mrb[8].mxu0 %vm184_vm2, %v233_v2  ;;  %1025 = vmatmul.mubr.msk.f32.vlgmr.msra.gmra.mrb[8].mxu1 %vm184_vm2, %v284_v57  ;;  %v250_v11 = vsel %vm184_vm2, %v1255_v10, 0.0 }
 0x1aa   :  { %251 = vadd.xlane.f32.xlu1 %v250_v11 }
 0x233   :  { %v236_v12 = vpop.xlane.xlu1 %235 }
 0x234   :  { %v237_v13 = vrot.slane %v236_v12, 4 }
 0x236   :  { %v238_v14 = vadd.f32 %v237_v13, %v236_v12 }
 0x237   :  { %v252_v20 = vpop.xlane.xlu1 %251 }
 0x238   :  { %v239_v15 = vrot.slane %v238_v14, 2  ;;  %v253_v21 = vrot.slane %v252_v20, 4 }
 0x23a   :  { %v240_v16 = vadd.f32 %v239_v15, %v238_v14  ;;  %v254_v26 = vadd.f32 %v253_v21, %v252_v20 }
 0x23c   :  { %v241_v17 = vrot.slane %v240_v16, 1  ;;  %v255_v33 = vrot.slane %v254_v26, 2 }
 0x23e   :  { %v242_v19 = vadd.f32 %v241_v17, %v240_v16  ;;  %v256_v44 = vadd.f32 %v255_v33, %v254_v26 }
 0x240   :  { %1027 = vpush %v242_v19  ;;  %v257_v54 = vrot.slane %v256_v44, 1 }
 0x242   :  { %v258_v2 = vadd.f32 %v257_v54, %v256_v44 }
 0x26b   :  { %v377_v22 = vpop.f32.mrb[2].mxu0 }
 0x26c   :  { %v381_v23 = vmul.f32 %v939_v6, %v377_v22  ;;  %v991_v24 = vpop.f32.mrb[3].mxu0 }
 0x26e   :  { %v382_v25 = vsel %vm294_vm6, %v381_v23, 0.0 }
 0x26f   :  { %v383_v27 = vrot.slane %v382_v25, 4  ;;  %v458_v28 = vpop.f32.mrb[2].mxu1 }
 0x270   :  { %v462_v29 = vmul.f32 %v939_v6, %v458_v28  ;;  %v996_v30 = vpop.f32.mrb[3].mxu1 }
 0x271   :  { %v384_v31 = vadd.f32 %v383_v27, %v382_v25  ;;  %s1028_s1 = spop %1027 }
 0x272   :  { %v463_v32 = vsel %vm294_vm6, %v462_v29, 0.0  ;;  %s244_s4 = smul.f32 0.017857144, %s1028_s1 }
 0x273   :  { %v385_v34 = vrot.slane %v384_v31, 2  ;;  %v464_v18 = vrot.slane %v463_v32, 4 }
 0x274   :  { %v245_v0 = vstv %s244_s4  ;;  %v539_v35 = vpop.f32.mrb[4].mxu0  ;;  %v609_v36 = vpop.f32.mrb[4].mxu1 }
 0x275   :  { %v465_v37 = vadd.f32 %v464_v18, %v463_v32  ;;  %1049 = vrcp.f32 %v245_v0  ;;  %v684_v38 = vmul.f32 %v609_v36, %v539_v35  ;;  %v1001_v39 = vpop.f32.mrb[5].mxu0  ;;  %v1006_v40 = vpop.f32.mrb[5].mxu1  ;;  %v386_v41 = vadd.f32 %v385_v34, %v384_v31 }
 0x277   :  { %v466_v42 = vrot.slane %v465_v37, 2  ;;  %v387_v43 = vrot.slane %v386_v41, 1 }
 0x278   :  { %v679_v45 = vpop.f32.mrb[6].mxu0  ;;  %v755_v46 = vpop.f32.mrb[6].mxu1 }
 0x279   :  { %v388_v47 = vadd.f32 %v387_v43, %v386_v41  ;;  %v680_v48 = vadd.f32 %v679_v45, %v377_v22  ;;  %v1011_v49 = vpop.f32.mrb[7].mxu0  ;;  %v1016_v50 = vpop.f32.mrb[7].mxu1  ;;  %v467_v51 = vadd.f32 %v466_v42, %v465_v37 }
 0x27b   :  { %v683_v52 = vsub.f32 %v680_v48, %v388_v47  ;;  %v468_v53 = vrot.slane %v467_v51, 1 }
 0x27c   :  { %v825_v55 = vpop.f32.mrb[8].mxu0  ;;  %v895_v56 = vpop.f32.mrb[8].mxu1 }
 0x27d   :  { %v685_v57 = vmul.f32 %v684_v38, %v683_v52  ;;  %v900_v58 = vmul.f32 %v825_v55, %v755_v46  ;;  %v469_v59 = vadd.f32 %v468_v53, %v467_v51  ;;  %v896_v60 = vadd.f32 %v895_v56, %v458_v28  ;;  %v1021_v61 = vpop.f32.mrb[9].mxu0  ;;  %v1026_v62 = vpop.f32.mrb[9].mxu1 }
 0x27f   :  { %v1050_v63 = vpop.eup %1049  ;;  %v899_v1 = vsub.f32 %v896_v60, %v469_v59 }
 0x280   :  { %1029 = vpush %v1050_v63 }
 0x281   :  { %v901_v4 = vmul.f32 %v900_v58, %v899_v1  ;;  %1031 = vpush %v258_v2 }
 0x283   :  { %v902_v5 = vsub.f32 %v685_v57, %v901_v4 }
 0x285   :  { %v903_v7 = vand.u32 2147483647, %v902_v5 }
 0x287   :  { %v904_v8 = vmin.f32 %v903_v7, 1.0 }
 0x289   :  { %v905_v9 = vmul.f32 0.5, %v904_v8 }
 0x28b   :  { %v906_v11 = vsub.f32 %v903_v7, %v905_v9 }
 0x28d   :  { %v907_v12 = vmul.f32 %v906_v11, %v904_v8 }
 0x28f   :  { %v908_v13 = vsel %vm294_vm6, %v907_v12, 0.0 }
 0x290   :  { %909 = vadd.xlane.f32.xlu1 %v908_v13 }
 0x2b1   :  { %s1030_s5 = spop %1029 }
 0x2b2   :  { %s1032_s6 = spop %1031  ;;  %v248_v16 = vstv %s1030_s5 }
 0x2b3   :  { %s260_s7 = smul.f32 0.017857144, %s1032_s6  ;;  %v249_v19 = vmul.f32 %v248_v16, %v1235_v3 }
 0x2b5   :  { %v261_v14 = vstv %s260_s7 }
 0x2b6   :  { %1051 = vrcp.f32 %v261_v14 }
 0x2c0   :  { %v1052_v15 = vpop.eup %1051 }
 0x2c1   :  { %1033 = vpush %v1052_v15 }
 0x2f2   :  { %s1034_s8 = spop %1033 }
 0x2f3   :  { %v264_v17 = vstv %s1034_s8 }
 0x2f4   :  { %v265_v20 = vmul.f32 %v264_v17, %v1255_v10 }
 0x2f6   :  { %v266_v6 = vsub.f32 %v249_v19, %v265_v20 }
 0x2f8   :  { %v267_v21 = vand.u32 2147483647, %v266_v6 }
 0x2fa   :  { %v268_v22 = vmin.f32 %v267_v21, 1.0 }
 0x2fc   :  { %v269_v23 = vmul.f32 0.5, %v268_v22 }
 0x2fe   :  { %v270_v24 = vsub.f32 %v267_v21, %v269_v23 }
 0x300   :  { %v271_v25 = vmul.f32 %v270_v24, %v268_v22 }
 0x302   :  { %v272_v26 = vsel %vm184_vm2, %v271_v25, 0.0 }
 0x303   :  { %273 = vadd.xlane.f32.xlu0 %v272_v26 }
 0x31d   :  { %v910_v27 = vpop.xlane.xlu1 %909 }
 0x31e   :  { %v911_v28 = vrot.slane %v910_v27, 4 }
 0x320   :  { %v912_v29 = vadd.f32 %v911_v28, %v910_v27 }
 0x322   :  { %v913_v30 = vrot.slane %v912_v29, 2 }
 0x324   :  { %v914_v34 = vadd.f32 %v913_v30, %v912_v29 }
 0x326   :  { %v915_v10 = vrot.slane %v914_v34, 1 }
 0x328   :  { %v916_v36 = vadd.f32 %v915_v10, %v914_v34 }
 0x390   :  { %v274_v31 = vpop.xlane.xlu0 %273 }
 0x391   :  { %v275_v32 = vrot.slane %v274_v31, 4 }
 0x393   :  { %v276_v33 = vadd.f32 %v275_v32, %v274_v31 }
 0x395   :  { %v277_v3 = vrot.slane %v276_v33, 2 }
 0x397   :  { %v278_v18 = vadd.f32 %v277_v3, %v276_v33 }
 0x399   :  { %v279_v0 = vrot.slane %v278_v18, 1 }
 0x39b   :  { %v280_v35 = vadd.f32 %v279_v0, %v278_v18 }
 0x39d   :  { %1035 = vpush %v280_v35 }
 0x39e   :  { %1037 = vpush %v916_v36 }
 0x3ce   :  { %s1036_s9 = spop %1035 }
 0x3cf   :  { %s282_s10 = smul.f32 0.125, %s1036_s9  ;;  %s1038_s11 = spop %1037 }
 0x3d0   :  { %s918_s12 = smul.f32 0.001953125, %s1038_s11 }
 0x3d1   :  { %s919_s13 = smul.f32 10.0, %s282_s10 }
 0x3d2   :  { %s920_s14 = smul.f32 10.0, %s918_s12 }
 0x3d4   :  { %s921_s15 = sadd.f32 %s920_s14, %s919_s13 }
 0x3d6   :  { %923 = sst [smem:[#allocation7]] %s921_s15 }
 0x3d7   :  { %1106 = shalt.err (!%p1103_p4)
}
 0x3d8   :  { %s1118_s23 = smov [#allocation7]  }
 0x3d9   :  { %931 = dma.smem_to_hbm %s1118_s23, 16, %s1284_s2, [#allocation4]  }
 0x3da   :  { %1111 = dma.done.wait [#allocation4], 16  }
 0x3db   :  { %1112 = vsyncadd [#allocation4], 4294967280 }
 0x3dc   :  { %935 = sfence }
 0x3dd   :  { %936 = vsyncpa [#allocation3], 1 }
 0x3de   :  { %937 = vsyncpa [#allocation6], 1 }
 0x3df   :  { %938 = vsyncpa [#allocation4], 1 }

</bundles_post_ra>
